<compile_context>
chip_gen: v7x
topology: tpu7x:2x2x1
jax: 0.10.0
libtpu: 0.0.40
codegen_flags: <defaults>
</compile_context>

<pallas_src>
import math

import jax
import jax.numpy as jnp
import numpy as np
from jax.experimental import pallas as pl
from jax.experimental.pallas import tpu as pltpu


def _gmm_estep_kernel(x_ref, prec_ref, mu_ref, sel_ref, bias_ref,
                      logresp_t_ref, lse_t_ref):
    """One tile of samples; all K components fused into full-width matmuls.

    x_ref        : (TN, D)    sample tile (streamed)
    prec_ref     : (D, KDp)   packed precision-Cholesky factors (resident)
    mu_ref       : (1, KDp)   packed mu_k @ prec_chol_k rows (resident)
    sel_ref      : (K, KDp)   block-diagonal selector, scaled by -0.5 (resident)
    bias_ref     : (K, 1)     -0.5*D*log(2pi) + log_det_k + log(w_k) (resident)
    logresp_t_ref: (K, TN)    out: log responsibilities (transposed, lane-dense)
    lse_t_ref    : (1, TN)    out: log_prob_norm (transposed row, lane-dense)
    """
    x = x_ref[...]                                                    # (TN, D)

    # One full-width MXU matmul for all K components at once.
    y = jnp.dot(x, prec_ref[...], preferred_element_type=jnp.float32)  # (TN, KDp)
    y = y - mu_ref[...]                                               # broadcast (1, KDp)
    z = y * y                                                         # (TN, KDp) dense

    # Single dense transpose to the components-minor orientation; the per-component
    # sum-of-squares (with the -0.5 factor folded in) becomes one MXU matmul.
    z_t = z.T                                                         # (KDp, TN)
    weighted = jnp.dot(sel_ref[...], z_t,
                       preferred_element_type=jnp.float32)            # (K, TN)
    weighted = weighted + bias_ref[...]                               # + (K, 1)

    # logsumexp over components (sublane axis; everything lane-dense).
    m = jnp.max(weighted, axis=0, keepdims=True)                      # (1, TN)
    s = jnp.sum(jnp.exp(weighted - m), axis=0, keepdims=True)         # (1, TN)
    lse = m + jnp.log(s)                                              # (1, TN)

    logresp_t_ref[...] = weighted - lse                               # (K, TN)
    lse_t_ref[...] = lse                                              # (1, TN)


def gmm_e_step(X, means, precision_cholesky, weights, *, tile_n=512):
    """JAX/Pallas equivalent of GaussianMixtureModel.forward (the e_step)."""
    N, D = X.shape
    K = weights.shape[0]
    assert tile_n % 128 == 0, "tile_n must be a multiple of 128"

    X = X.astype(jnp.float32)
    means = means.astype(jnp.float32)
    precision_cholesky = precision_cholesky.astype(jnp.float32)
    weights = weights.astype(jnp.float32)

    # ---- cheap parameter-only glue, O(K*D^2) ----
    kd = K * D
    kd_pad = max(128, ((kd + 127) // 128) * 128)      # lane-align the packed width

    # prec_packed[d, k*D + j] = prec_chol[k, d, j]
    prec_packed = jnp.transpose(precision_cholesky, (1, 0, 2)).reshape(D, kd)
    # packed (mu_k @ prec_chol_k): row k*D + j = sum_d mu[k,d] * prec[k,d,j]
    mu_packed = jnp.einsum('kd,kdj->kj', means, precision_cholesky,
                           precision='highest').reshape(1, kd)
    # block-diagonal selector with the -0.5 factor folded in: (K, K*D)
    comp_of_col = jnp.arange(kd, dtype=jnp.int32) // D
    sel = jnp.where(
        comp_of_col[None, :] == jnp.arange(K, dtype=jnp.int32)[:, None],
        jnp.float32(-0.5), jnp.float32(0.0))
    if kd_pad != kd:
        prec_packed = jnp.pad(prec_packed, ((0, 0), (0, kd_pad - kd)))
        mu_packed = jnp.pad(mu_packed, ((0, 0), (0, kd_pad - kd)))
        sel = jnp.pad(sel, ((0, 0), (0, kd_pad - kd)))

    # fused bias: -0.5*D*log(2*pi) + log_det + log(weights)   -> (K, 1)
    diag = jnp.diagonal(precision_cholesky, axis1=1, axis2=2)          # (K, D)
    log_det = jnp.sum(jnp.log(diag), axis=1)                           # (K,)
    bias = (jnp.float32(-0.5 * D * math.log(2.0 * math.pi))
            + log_det + jnp.log(weights)).reshape(K, 1)

    # ---- pad the sample axis to a multiple of the tile ----
    n_pad = pl.cdiv(N, tile_n) * tile_n
    x_pad = X if n_pad == N else jnp.pad(X, ((0, n_pad - N), (0, 0)))

    grid = (n_pad // tile_n,)
    log_resp_t, lse_t = pl.pallas_call(
        _gmm_estep_kernel,
        out_shape=(
            jax.ShapeDtypeStruct((K, n_pad), jnp.float32),
            jax.ShapeDtypeStruct((1, n_pad), jnp.float32),
        ),
        grid_spec=pl.GridSpec(
            grid=grid,
            in_specs=[
                pl.BlockSpec((tile_n, D), lambda i: (i, 0)),      # X tile (streamed)
                pl.BlockSpec((D, kd_pad), lambda i: (0, 0)),      # packed prec (resident)
                pl.BlockSpec((1, kd_pad), lambda i: (0, 0)),      # packed mu @ prec
                pl.BlockSpec((K, kd_pad), lambda i: (0, 0)),      # -0.5 selector
                pl.BlockSpec((K, 1), lambda i: (0, 0)),           # fused bias
            ],
            out_specs=[
                pl.BlockSpec((K, tile_n), lambda i: (0, i)),      # log_resp (transposed)
                pl.BlockSpec((1, tile_n), lambda i: (0, i)),      # log_prob_norm row
            ],
        ),
        compiler_params=pltpu.CompilerParams(
            dimension_semantics=("parallel",)),
    )(x_pad, prec_packed, mu_packed, sel, bias)

    log_prob_norm = lse_t[0, :N]                                       # (N,)
    log_resp = jnp.transpose(log_resp_t[:, :N])                        # back to (N, K)
    # e_step returns (mean(log_prob_norm), log_resp)
    return jnp.mean(log_prob_norm), log_resp


def _reference_e_step(X, means, precision_cholesky, weights):
    """Pure-JAX reference, mirroring the PyTorch module line-for-line."""
    N, D = X.shape
    diag = jnp.diagonal(precision_cholesky, axis1=1, axis2=2)
    log_det = jnp.sum(jnp.log(diag), axis=1)                           # (K,)
    y = jnp.einsum('nd,kde->nke', X, precision_cholesky, precision='highest') \
        - jnp.einsum('kd,kde->ke', means, precision_cholesky,
                     precision='highest')[None]
    log_prob = jnp.sum(y * y, axis=2)                                  # (N, K)
    log_gauss = -0.5 * (D * jnp.log(2.0 * jnp.pi) + log_prob) + log_det
    weighted = log_gauss + jnp.log(weights)
    lse = jax.scipy.special.logsumexp(weighted, axis=1)
    return jnp.mean(lse), weighted - lse[:, None]


if __name__ == "__main__":
    # Small shapes consistent with the module: N samples, D features, K components.
    N, D, K = 4096, 16, 8
    key = jax.random.PRNGKey(0)
    kx, km, kp, kw = jax.random.split(key, 4)

    X = jax.random.normal(kx, (N, D), dtype=jnp.float32)
    means = jax.random.normal(km, (K, D), dtype=jnp.float32)

    # Valid precision-Cholesky factors: lower-triangular, strictly positive diagonal.
    A = 0.1 * jax.random.normal(kp, (K, D, D), dtype=jnp.float32)
    diag_vals = 0.5 + jax.nn.softplus(jnp.diagonal(A, axis1=1, axis2=2))  # (K, D) > 0
    prec_chol = jnp.tril(A, k=-1) + jax.vmap(jnp.diag)(diag_vals)
    weights = jax.nn.softmax(jax.random.normal(kw, (K,), dtype=jnp.float32))

    mean_lpn, log_resp = gmm_e_step(X, means, prec_chol, weights)
    jax.block_until_ready((mean_lpn, log_resp))

    ref_mean_lpn, ref_log_resp = _reference_e_step(X, means, prec_chol, weights)
    np.testing.assert_allclose(np.asarray(mean_lpn), np.asarray(ref_mean_lpn),
                               rtol=1e-4, atol=1e-4)
    np.testing.assert_allclose(np.asarray(log_resp), np.asarray(ref_log_resp),
                               rtol=1e-4, atol=1e-4)

    print("KERNEL_OK")
</pallas_src>

<mosaic_0001>
module attributes {stable_mosaic.version = 11 : i64} {
  func.func @_gmm_estep_kernel(%arg0: i32, %arg1: memref<512x16xf32, #tpu.memory_space<vmem>>, %arg2: memref<16x128xf32, #tpu.memory_space<vmem>>, %arg3: memref<1x128xf32, #tpu.memory_space<vmem>>, %arg4: memref<8x128xf32, #tpu.memory_space<vmem>>, %arg5: memref<8x1xf32, #tpu.memory_space<vmem>>, %arg6: memref<8x512xf32, #tpu.memory_space<vmem>>, %arg7: memref<1x512xf32, #tpu.memory_space<vmem>>) attributes {dimension_semantics = [#tpu.dimension_semantics<parallel>], iteration_bounds = array<i64: 8>, scalar_prefetch = 0 : i64, scratch_operands = 0 : i64, tpu.core_type = #tpu.core_type<tc>, window_params = [{transform_indices = @transform_0, window_bounds = array<i64: 512, 16>}, {pipeline_mode = #tpu.pipeline_mode<synchronous>, transform_indices = @transform_1, window_bounds = array<i64: 16, 128>}, {pipeline_mode = #tpu.pipeline_mode<synchronous>, transform_indices = @transform_2, window_bounds = array<i64: 1, 128>}, {pipeline_mode = #tpu.pipeline_mode<synchronous>, transform_indices = @transform_3, window_bounds = array<i64: 8, 128>}, {pipeline_mode = #tpu.pipeline_mode<synchronous>, transform_indices = @transform_4, window_bounds = array<i64: 8, 1>}, {transform_indices = @transform_5, window_bounds = array<i64: 8, 512>}, {transform_indices = @transform_6, window_bounds = array<i64: 1, 512>}]} {
    %c0 = arith.constant 0 : index
    %c0_0 = arith.constant 0 : index
    %0 = vector.load %arg1[%c0, %c0_0] : memref<512x16xf32, #tpu.memory_space<vmem>>, vector<512x16xf32>
    %c0_1 = arith.constant 0 : index
    %c0_2 = arith.constant 0 : index
    %1 = vector.load %arg2[%c0_1, %c0_2] : memref<16x128xf32, #tpu.memory_space<vmem>>, vector<16x128xf32>
    %cst = arith.constant dense<0.000000e+00> : vector<512x128xf32>
    %2 = tpu.matmul %0, %1, %cst {dimension_numbers = #tpu.dot_dimension_numbers<[1], [0], [0], [1], [0, 0, 1, 1], [], []>} : vector<512x16xf32>, vector<16x128xf32>, vector<512x128xf32> -> vector<512x128xf32>
    %c0_3 = arith.constant 0 : index
    %c0_4 = arith.constant 0 : index
    %3 = vector.load %arg3[%c0_3, %c0_4] : memref<1x128xf32, #tpu.memory_space<vmem>>, vector<1x128xf32>
    %4 = vector.broadcast %3 : vector<1x128xf32> to vector<512x128xf32>
    %5 = arith.subf %2, %4 : vector<512x128xf32>
    %6 = arith.mulf %5, %5 : vector<512x128xf32>
    %7 = tpu.transpose %6, [1, 0] : vector<512x128xf32> -> vector<128x512xf32>
    %c0_5 = arith.constant 0 : index
    %c0_6 = arith.constant 0 : index
    %8 = vector.load %arg4[%c0_5, %c0_6] : memref<8x128xf32, #tpu.memory_space<vmem>>, vector<8x128xf32>
    %cst_7 = arith.constant dense<0.000000e+00> : vector<8x512xf32>
    %9 = tpu.matmul %8, %7, %cst_7 {dimension_numbers = #tpu.dot_dimension_numbers<[1], [0], [0], [1], [0, 0, 1, 1], [], []>} : vector<8x128xf32>, vector<128x512xf32>, vector<8x512xf32> -> vector<8x512xf32>
    %c0_8 = arith.constant 0 : index
    %c0_9 = arith.constant 0 : index
    %10 = vector.load %arg5[%c0_8, %c0_9] : memref<8x1xf32, #tpu.memory_space<vmem>>, vector<8x1xf32>
    %11 = vector.broadcast %10 : vector<8x1xf32> to vector<8x512xf32>
    %12 = arith.addf %9, %11 : vector<8x512xf32>
    %cst_10 = arith.constant dense<0xFF800000> : vector<512xf32>
    %13 = vector.multi_reduction <maximumf>, %12, %cst_10 [0] : vector<8x512xf32> to vector<512xf32>
    %14 = vector.shape_cast %13 : vector<512xf32> to vector<1x512xf32>
    %15 = vector.broadcast %14 : vector<1x512xf32> to vector<8x512xf32>
    %16 = arith.subf %12, %15 : vector<8x512xf32>
    %17 = math.exp %16 : vector<8x512xf32>
    %cst_11 = arith.constant dense<0.000000e+00> : vector<512xf32>
    %18 = vector.multi_reduction <add>, %17, %cst_11 [0] : vector<8x512xf32> to vector<512xf32>
    %19 = vector.shape_cast %18 : vector<512xf32> to vector<1x512xf32>
    %20 = math.log %19 : vector<1x512xf32>
    %21 = arith.addf %14, %20 : vector<1x512xf32>
    %22 = vector.broadcast %21 : vector<1x512xf32> to vector<8x512xf32>
    %23 = arith.subf %12, %22 : vector<8x512xf32>
    %c0_12 = arith.constant 0 : index
    %c0_13 = arith.constant 0 : index
    %24 = vector.load %arg6[%c0_12, %c0_13] : memref<8x512xf32, #tpu.memory_space<vmem>>, vector<8x512xf32>
    tpu.vector_store %arg6[%c0_12, %c0_13], %23 {strides = array<i32>} : memref<8x512xf32, #tpu.memory_space<vmem>>, vector<8x512xf32>,
    %c0_14 = arith.constant 0 : index
    %c0_15 = arith.constant 0 : index
    %25 = vector.load %arg7[%c0_14, %c0_15] : memref<1x512xf32, #tpu.memory_space<vmem>>, vector<1x512xf32>
    tpu.vector_store %arg7[%c0_14, %c0_15], %21 {strides = array<i32>} : memref<1x512xf32, #tpu.memory_space<vmem>>, vector<1x512xf32>,
    return
  }
  func.func @transform_0(%arg0: i32) -> (i32, i32) {
    %c0_i32 = arith.constant 0 : i32
    %c0_i32_0 = arith.constant 0 : i32
    return %arg0, %c0_i32 : i32, i32
  }
  func.func @transform_1(%arg0: i32) -> (i32, i32) {
    %c0_i32 = arith.constant 0 : i32
    %c0_i32_0 = arith.constant 0 : i32
    %c0_i32_1 = arith.constant 0 : i32
    return %c0_i32, %c0_i32_0 : i32, i32
  }
  func.func @transform_2(%arg0: i32) -> (i32, i32) {
    %c0_i32 = arith.constant 0 : i32
    %c0_i32_0 = arith.constant 0 : i32
    %c0_i32_1 = arith.constant 0 : i32
    return %c0_i32, %c0_i32_0 : i32, i32
  }
  func.func @transform_3(%arg0: i32) -> (i32, i32) {
    %c0_i32 = arith.constant 0 : i32
    %c0_i32_0 = arith.constant 0 : i32
    %c0_i32_1 = arith.constant 0 : i32
    return %c0_i32, %c0_i32_0 : i32, i32
  }
  func.func @transform_4(%arg0: i32) -> (i32, i32) {
    %c0_i32 = arith.constant 0 : i32
    %c0_i32_0 = arith.constant 0 : i32
    %c0_i32_1 = arith.constant 0 : i32
    return %c0_i32, %c0_i32_0 : i32, i32
  }
  func.func @transform_5(%arg0: i32) -> (i32, i32) {
    %c0_i32 = arith.constant 0 : i32
    %c0_i32_0 = arith.constant 0 : i32
    return %c0_i32, %arg0 : i32, i32
  }
  func.func @transform_6(%arg0: i32) -> (i32, i32) {
    %c0_i32 = arith.constant 0 : i32
    %c0_i32_0 = arith.constant 0 : i32
    return %c0_i32, %arg0 : i32, i32
  }
}

</mosaic_0001>

<bundles_post_ra>
// kernel: tpu_custom_call.1
= control target key start
LH: loop header
LB: loop body
LE: loop exit
PB: predicated region body
PF: predicated region fallthrough
CT: control target
= control target key end

     0   :  { %12 = vsyncpa [#allocation3], 0  ;;  %s2538_s0 = inlined_call_operand.vmem [shape: f32[4096,16], index: 0, kind: input, shape index: {}]   ;;  %s2539_s1 = inlined_call_operand.vmem [shape: f32[16,128], index: 1, kind: input, shape index: {}]   ;;  %s2540_s2 = inlined_call_operand.vmem [shape: f32[1,128], index: 2, kind: input, shape index: {}]   ;;  %s2541_s3 = inlined_call_operand.vmem [shape: f32[8,128], index: 3, kind: input, shape index: {}]   ;;  %s2542_s4 = inlined_call_operand.vmem [shape: f32[8,1], index: 4, kind: input, shape index: {}]   ;;  %s2543_s5 = inlined_call_operand.hbm [shape: f32[8,4096], index: 5, kind: output, shape index: {0}]   ;;  %s2544_s6 = inlined_call_operand.hbm [shape: f32[1,4096], index: 6, kind: output, shape index: {1}]  }
   0x1   :  { %14 = vsyncpa [#allocation3 + $0x1], 0 }
   0x2   :  { %15 = vsyncpa [#allocation5], 0 }
   0x3   :  { %17 = vsyncpa [#allocation5 + $0x1], 0  ;;  %s2015_s21 = smov 0   ;;  %s2017_s22 = smov 0  }
   0x4   :  { %s2019_s23 = smov 0   ;;  %s2021_s24 = smov 0  }
   0x5 LB: > { %s2036_s25 = sadd.s32 4294967295, %s1974_s24   ;;  %s1432_s26 = sadd.s32 4294967294, %s1974_s24   ;;  %s1974_s24 = sphi %s2021_s24, %s2550_s24   ;;  %s1970_s23 = sphi %s2019_s23, %s2549_s23   ;;  %s1966_s22 = sphi %s2017_s22, %s2548_s22   ;;  %s1962_s21 = sphi %s2015_s21, %s2547_s21  }
   0x6   : > { %s2040_s27 = sadd.s32 1, %s1974_s24   ;;  %s140_s28 = sadd.s32 1, %s1970_s23 }
   0x7   : > { %s137_s29 = ssub.s32 %s1974_s24, %s2040_s27  ;;  %p150_p0 = scmp.ne.s32.totalorder %s1970_s23, %s1966_s22 }
   0x8   : > { %p138_p1 = scmp.eq.s32.totalorder %s137_s29, 0  ;;  %p151_p2 = scmp.eq.s32.totalorder %s2036_s25, 7 }
   0x9   : > { %p156_p3 = scmp.ne.s32.totalorder %s1966_s22, %s1962_s21  ;;  %p157_p4 = scmp.eq.s32.totalorder %s1432_s26, 7 }
   0xa   : > { %s2051_s30 = scalar_select %p138_p1, %s1970_s23, %s140_s28  }
   0xb   : > { %p2053_p5 = por %p151_p2, %p150_p0  ;;  %p2057_p6 = por %p157_p4, %p156_p3 }
   0xc   : > { %p1435_p7 = scmp.ge.s32.totalorder %s1974_s24, 1  ;;  %p222_p8 = scmp.lt.s32.totalorder %s1974_s24, 9 }
   0xe   : > { %p223_p9 = pnand %p1435_p7, %p222_p8 }
   0xf   : > { %v329_v0 = vld [vmem:[%s2539_s1] sm:$0xff] (!%p223_p9)  ;;  %v330_v1 = vld [vmem:[%s2539_s1 + $0x8] sm:$0xff] (!%p223_p9)  ;;  %s2070_s13 = sshll.u32 (!%p223_p9), %s2036_s25, 6  ;;  %vm331_vm0 = vcmask (!%p223_p9), 130048   ;;  %s2433_s10 = sand.u32 (!%p223_p9), 1, %s1966_s22  }
  0x10   : > { %226 = sbr.rel (%p223_p9) target bundleno = 716 (0x2cc), region = 40  ;;  %v1749_v2 = vpack.c.bf16 (!%p223_p9), %v330_v1, %v329_v0  ;;  %p258_p10 = scmp.lt.s32.totalorder (!%p223_p9), %s2070_s13, 511 }
  0x11   : > { %s1436_s11 = sshll.u32 (!%p223_p9), %s2433_s10, 5  ;;  %s1308_s26 = scalar_lea.sflag (!%p223_p9), [#allocation3], %s2433_s10 }
  0x12   : > { %1750 = vmatprep.subr.bf16.mxu0 (!%p223_p9), %v1749_v2  ;;  %s2444_s12 = scalar_lea.vmem (!%p223_p9), [#allocation2], %s1436_s11  ;;  %s1978_s29 = smov (!%p223_p9), [#allocation2]  }
  0x13   : > { %1752 = vmatpush3.bf16.msra.mxu0 (!%p223_p9), %v1749_v2  ;;  %s1327_s16 = sshll.u32 (!%p223_p9), %s2444_s12, 4  ;;  %s1884_s9 = sshll.u32 (!%p223_p9), %s1978_s29, 4  ;;  %s2456_s16 = int_to_ptr.vmem [resolvable:$true] %s1327_s16  ;;  %s1885_s9 = int_to_ptr.vmem [resolvable:$false] %s1884_s9 }
  0x14   : > { %s1880_s28 = scalar_lea.vmem (!%p223_p9), %s2456_s16, 512  ;;  %s1886_s11 = scalar_lea.vmem (!%p223_p9), %s1885_s9, 1024 }
  0x15   : > { %p1881_p11 = scmp.ne.s32.totalorder (!%p223_p9), %s2456_s16, %s1880_s28  ;;  %p1887_p0 = scmp.lt.s32.totalorder (!%p223_p9), %s2456_s16, %s1885_s9 }
  0x16   : > { %p1888_p1 = scmp.lt.s32.totalorder (!%p223_p9), %s1886_s11, %s1880_s28 }
  0x17   : > { %s259_s14 = scalar_select %p258_p10, %s2070_s13, 511 }
  0x18   : > { %p1882_p12 = pnand %p1881_p11, %p2053_p5  ;;  %p1889_p2 = por %p1888_p1, %p1887_p0 }
  0x19   : > { %s1439_s15 = sshll.u32 %s259_s14, 3  ;;  %s1437_s14 = sshll.u32 %s2433_s10, 2 }
  0x1a   : > { %s2077_s18 = scalar_lea.vmem %s2538_s0, %s1439_s15  ;;  %s1513_s15 = sshll.u32 %s2036_s25, 9 }
  0x1b   : > { %v265_v3 = vld [vmem:[%s2077_s18] sm:$0xff]  ;;  %v266_v4 = vld [vmem:[%s2077_s18 + $0x8] sm:$0xff]  ;;  %v267_v5 = vld [vmem:[%s2077_s18 + $0x10] sm:$0xff]  ;;  %s2454_s19 = scalar_lea.hbm %s2543_s5, %s1513_s15  ;;  %s2463_s25 = scalar_lea.vmem [#allocation4], %s1437_s14 }
  0x1c   : > { %1653 = vmatprep.mubr.msk.f32.mxu0 %vm331_vm0, %v265_v3  ;;  %v268_v6 = vld [vmem:[%s2077_s18 + $0x18] sm:$0xff]  ;;  %v269_v7 = vld [vmem:[%s2077_s18 + $0x20] sm:$0xff]  ;;  %v270_v8 = vld [vmem:[%s2077_s18 + $0x28] sm:$0xff]  ;;  %s1341_s20 = sshll.u32 %s2463_s25, 4  ;;  %p1883_p13 = pneg %p1882_p12  ;;  %s2496_s20 = int_to_ptr.vmem [resolvable:$true] %s1341_s20 }
  0x1d   : > { %1654 = vmatmul.mubr.msk.f32.vlgmr.msra.gmra.mrb[0].mxu0 %vm331_vm0, %v266_v4  ;;  %v271_v9 = vld [vmem:[%s2077_s18 + $0x30] sm:$0xff]  ;;  %v272_v10 = vld [vmem:[%s2077_s18 + $0x38] sm:$0xff]  ;;  %v273_v11 = vld [vmem:[%s2077_s18 + $0x40] sm:$0xff] }
  0x1e   : > { %1656 = vmatprep.mubr.msk.f32.mxu0 %vm331_vm0, %v267_v5  ;;  %v274_v12 = vld [vmem:[%s2077_s18 + $0x48] sm:$0xff]  ;;  %v275_v13 = vld [vmem:[%s2077_s18 + $0x50] sm:$0xff]  ;;  %v276_v14 = vld [vmem:[%s2077_s18 + $0x58] sm:$0xff]  ;;  %p1890_p3 = pnand %p1889_p2, %p1883_p13 }
  0x1f   : > { %v277_v15 = vld [vmem:[%s2077_s18 + $0x60] sm:$0xff]  ;;  %v278_v16 = vld [vmem:[%s2077_s18 + $0x68] sm:$0xff]  ;;  %v279_v17 = vld [vmem:[%s2077_s18 + $0x70] sm:$0xff] }
  0x20   : > { %v280_v18 = vld [vmem:[%s2077_s18 + $0x78] sm:$0xff]  ;;  %v281_v19 = vld [vmem:[%s2077_s18 + $0x80] sm:$0xff]  ;;  %v282_v20 = vld [vmem:[%s2077_s18 + $0x88] sm:$0xff] }
  0x21   : > { %1657 = vmatmul.mubr.msk.f32.gmra.mrb[2].mxu0 %vm331_vm0, %v268_v6  ;;  %v283_v21 = vld [vmem:[%s2077_s18 + $0x90] sm:$0xff]  ;;  %v284_v22 = vld [vmem:[%s2077_s18 + $0x98] sm:$0xff]  ;;  %v285_v23 = vld [vmem:[%s2077_s18 + $0xa0] sm:$0xff] }
  0x22   : > { %1659 = vmatprep.mubr.msk.f32.mxu0 %vm331_vm0, %v269_v7  ;;  %v286_v24 = vld [vmem:[%s2077_s18 + $0xa8] sm:$0xff]  ;;  %v287_v25 = vld [vmem:[%s2077_s18 + $0xb0] sm:$0xff]  ;;  %v288_v26 = vld [vmem:[%s2077_s18 + $0xb8] sm:$0xff] }
  0x23   : > { %v289_v27 = vld [vmem:[%s2077_s18 + $0xc0] sm:$0xff]  ;;  %v290_v28 = vld [vmem:[%s2077_s18 + $0xc8] sm:$0xff]  ;;  %v291_v29 = vld [vmem:[%s2077_s18 + $0xd0] sm:$0xff] }
  0x24   : > { %v292_v30 = vld [vmem:[%s2077_s18 + $0xd8] sm:$0xff]  ;;  %v293_v31 = vld [vmem:[%s2077_s18 + $0xe0] sm:$0xff]  ;;  %v294_v32 = vld [vmem:[%s2077_s18 + $0xe8] sm:$0xff] }
  0x25   : > { %1660 = vmatmul.mubr.msk.f32.gmra.mrb[4].mxu0 %vm331_vm0, %v270_v8  ;;  %v295_v33 = vld [vmem:[%s2077_s18 + $0xf0] sm:$0xff]  ;;  %v296_v34 = vld [vmem:[%s2077_s18 + $0xf8] sm:$0xff]  ;;  %v297_v35 = vld [vmem:[%s2077_s18 + $0x100] sm:$0xff] }
  0x26   : > { %1662 = vmatprep.mubr.msk.f32.mxu0 %vm331_vm0, %v271_v9  ;;  %v298_v36 = vld [vmem:[%s2077_s18 + $0x108] sm:$0xff]  ;;  %v299_v37 = vld [vmem:[%s2077_s18 + $0x110] sm:$0xff]  ;;  %v300_v38 = vld [vmem:[%s2077_s18 + $0x118] sm:$0xff] }
  0x27   : > { %v301_v39 = vld [vmem:[%s2077_s18 + $0x120] sm:$0xff]  ;;  %v302_v40 = vld [vmem:[%s2077_s18 + $0x128] sm:$0xff]  ;;  %v303_v41 = vld [vmem:[%s2077_s18 + $0x130] sm:$0xff] }
  0x28   : > { %v304_v42 = vld [vmem:[%s2077_s18 + $0x138] sm:$0xff]  ;;  %v305_v43 = vld [vmem:[%s2077_s18 + $0x140] sm:$0xff]  ;;  %v306_v44 = vld [vmem:[%s2077_s18 + $0x148] sm:$0xff] }
  0x29   : > { %1663 = vmatmul.mubr.msk.f32.gmra.mrb[6].mxu0 %vm331_vm0, %v272_v10  ;;  %v307_v45 = vld [vmem:[%s2077_s18 + $0x150] sm:$0xff]  ;;  %v308_v46 = vld [vmem:[%s2077_s18 + $0x158] sm:$0xff]  ;;  %v309_v47 = vld [vmem:[%s2077_s18 + $0x160] sm:$0xff] }
  0x2a   : > { %1665 = vmatprep.mubr.msk.f32.mxu0 %vm331_vm0, %v273_v11  ;;  %v310_v48 = vld [vmem:[%s2077_s18 + $0x168] sm:$0xff]  ;;  %v311_v49 = vld [vmem:[%s2077_s18 + $0x170] sm:$0xff]  ;;  %v312_v50 = vld [vmem:[%s2077_s18 + $0x178] sm:$0xff] }
  0x2b   : > { %v313_v51 = vld [vmem:[%s2077_s18 + $0x180] sm:$0xff]  ;;  %v314_v52 = vld [vmem:[%s2077_s18 + $0x188] sm:$0xff]  ;;  %v315_v53 = vld [vmem:[%s2077_s18 + $0x190] sm:$0xff] }
  0x2c   : > { %v316_v54 = vld [vmem:[%s2077_s18 + $0x198] sm:$0xff]  ;;  %v317_v55 = vld [vmem:[%s2077_s18 + $0x1a0] sm:$0xff]  ;;  %v318_v56 = vld [vmem:[%s2077_s18 + $0x1a8] sm:$0xff] }
  0x2d   : > { %1666 = vmatmul.mubr.msk.f32.gmra.mrb[8].mxu0 %vm331_vm0, %v274_v12  ;;  %v319_v57 = vld [vmem:[%s2077_s18 + $0x1b0] sm:$0xff]  ;;  %v320_v58 = vld [vmem:[%s2077_s18 + $0x1b8] sm:$0xff]  ;;  %v321_v59 = vld [vmem:[%s2077_s18 + $0x1c0] sm:$0xff] }
  0x2e   : > { %1668 = vmatprep.mubr.msk.f32.mxu0 %vm331_vm0, %v275_v13  ;;  %v322_v60 = vld [vmem:[%s2077_s18 + $0x1c8] sm:$0xff]  ;;  %v323_v61 = vld [vmem:[%s2077_s18 + $0x1d0] sm:$0xff]  ;;  %v324_v62 = vld [vmem:[%s2077_s18 + $0x1d8] sm:$0xff] }
  0x2f   : > { %v325_v63 = vld [vmem:[%s2077_s18 + $0x1e0] sm:$0xff]  ;;  %v326_v0 = vld [vmem:[%s2077_s18 + $0x1e8] sm:$0xff]  ;;  %v327_v1 = vld [vmem:[%s2077_s18 + $0x1f0] sm:$0xff] }
  0x30   : > { %v328_v2 = vld [vmem:[%s2077_s18 + $0x1f8] sm:$0xff]  ;;  %v2210_v3 = vld [vmem:[%s2541_s3] sm:$0xff] }
  0x31   : > { %1669 = vmatmul.mubr.msk.f32.gmra.mrb[10].mxu0 %vm331_vm0, %v276_v14  ;;  %1613 = vmatprep.mubr.f32.mxu1 %v2210_v3  ;;  %v2216_v4 = vld [vmem:[%s2540_s2] ss:$0 sm:$0xff] }
  0x32   : > { %1671 = vmatprep.mubr.msk.f32.mxu0 %vm331_vm0, %v277_v15 }
  0x35   : > { %1672 = vmatmul.mubr.msk.f32.gmra.mrb[12].mxu0 %vm331_vm0, %v278_v16 }
  0x36   : > { %1674 = vmatprep.mubr.msk.f32.mxu0 %vm331_vm0, %v279_v17 }
  0x39   : > { %1675 = vmatmul.mubr.msk.f32.gmra.mrb[14].mxu0 %vm331_vm0, %v280_v18 }
  0x3a   : > { %1677 = vmatprep.mubr.msk.f32.mxu0 %vm331_vm0, %v281_v19 }
  0x3d   : > { %1678 = vmatmul.mubr.msk.f32.gmra.mrb[16].mxu0 %vm331_vm0, %v282_v20 }
  0x3e   : > { %1680 = vmatprep.mubr.msk.f32.mxu0 %vm331_vm0, %v283_v21 }
  0x41   : > { %1681 = vmatmul.mubr.msk.f32.gmra.mrb[18].mxu0 %vm331_vm0, %v284_v22 }
  0x42   : > { %1683 = vmatprep.mubr.msk.f32.mxu0 %vm331_vm0, %v285_v23 }
  0x45   : > { %1684 = vmatmul.mubr.msk.f32.gmra.mrb[20].mxu0 %vm331_vm0, %v286_v24 }
  0x46   : > { %1686 = vmatprep.mubr.msk.f32.mxu0 %vm331_vm0, %v287_v25 }
  0x49   : > { %1687 = vmatmul.mubr.msk.f32.gmra.mrb[22].mxu0 %vm331_vm0, %v288_v26 }
  0x4a   : > { %1689 = vmatprep.mubr.msk.f32.mxu0 %vm331_vm0, %v289_v27 }
  0x4d   : > { %1690 = vmatmul.mubr.msk.f32.gmra.mrb[24].mxu0 %vm331_vm0, %v290_v28 }
  0x4e   : > { %1692 = vmatprep.mubr.msk.f32.mxu0 %vm331_vm0, %v291_v29 }
  0x51   : > { %1693 = vmatmul.mubr.msk.f32.gmra.mrb[26].mxu0 %vm331_vm0, %v292_v30 }
  0x52   : > { %1695 = vmatprep.mubr.msk.f32.mxu0 %vm331_vm0, %v293_v31 }
  0x55   : > { %1696 = vmatmul.mubr.msk.f32.gmra.mrb[28].mxu0 %vm331_vm0, %v294_v32 }
  0x56   : > { %1698 = vmatprep.mubr.msk.f32.mxu0 %vm331_vm0, %v295_v33 }
  0x59   : > { %1699 = vmatmul.mubr.msk.f32.gmra.mrb[30].mxu0 %vm331_vm0, %v296_v34 }
  0x5a   : > { %1701 = vmatprep.mubr.msk.f32.mxu0 %vm331_vm0, %v297_v35 }
  0x5d   : > { %1702 = vmatmul.mubr.msk.f32.gmra.mrb[32].mxu0 %vm331_vm0, %v298_v36 }
  0x5e   : > { %1704 = vmatprep.mubr.msk.f32.mxu0 %vm331_vm0, %v299_v37 }
  0x61   : > { %1705 = vmatmul.mubr.msk.f32.gmra.mrb[34].mxu0 %vm331_vm0, %v300_v38 }
  0x62   : > { %1707 = vmatprep.mubr.msk.f32.mxu0 %vm331_vm0, %v301_v39 }
  0x65   : > { %1708 = vmatmul.mubr.msk.f32.gmra.mrb[36].mxu0 %vm331_vm0, %v302_v40 }
  0x66   : > { %1710 = vmatprep.mubr.msk.f32.mxu0 %vm331_vm0, %v303_v41 }
  0x69   : > { %1711 = vmatmul.mubr.msk.f32.gmra.mrb[38].mxu0 %vm331_vm0, %v304_v42 }
  0x6a   : > { %1713 = vmatprep.mubr.msk.f32.mxu0 %vm331_vm0, %v305_v43 }
  0x6d   : > { %1714 = vmatmul.mubr.msk.f32.gmra.mrb[40].mxu0 %vm331_vm0, %v306_v44 }
  0x6e   : > { %1716 = vmatprep.mubr.msk.f32.mxu0 %vm331_vm0, %v307_v45 }
  0x71   : > { %1717 = vmatmul.mubr.msk.f32.gmra.mrb[42].mxu0 %vm331_vm0, %v308_v46 }
  0x72   : > { %1719 = vmatprep.mubr.msk.f32.mxu0 %vm331_vm0, %v309_v47 }
  0x75   : > { %1720 = vmatmul.mubr.msk.f32.gmra.mrb[44].mxu0 %vm331_vm0, %v310_v48 }
  0x76   : > { %1722 = vmatprep.mubr.msk.f32.mxu0 %vm331_vm0, %v311_v49 }
  0x79   : > { %1723 = vmatmul.mubr.msk.f32.gmra.mrb[46].mxu0 %vm331_vm0, %v312_v50 }
  0x7a   : > { %1725 = vmatprep.mubr.msk.f32.mxu0 %vm331_vm0, %v313_v51 }
  0x7d   : > { %1726 = vmatmul.mubr.msk.f32.gmra.mrb[48].mxu0 %vm331_vm0, %v314_v52 }
  0x7e   : > { %1728 = vmatprep.mubr.msk.f32.mxu0 %vm331_vm0, %v315_v53 }
  0x81   : > { %1729 = vmatmul.mubr.msk.f32.gmra.mrb[50].mxu0 %vm331_vm0, %v316_v54 }
  0x82   : > { %1731 = vmatprep.mubr.msk.f32.mxu0 %vm331_vm0, %v317_v55 }
  0x85   : > { %1732 = vmatmul.mubr.msk.f32.gmra.mrb[52].mxu0 %vm331_vm0, %v318_v56 }
  0x86   : > { %1734 = vmatprep.mubr.msk.f32.mxu0 %vm331_vm0, %v319_v57 }
  0x89   : > { %1735 = vmatmul.mubr.msk.f32.gmra.mrb[54].mxu0 %vm331_vm0, %v320_v58 }
  0x8a   : > { %1737 = vmatprep.mubr.msk.f32.mxu0 %vm331_vm0, %v321_v59 }
  0x8d   : > { %1738 = vmatmul.mubr.msk.f32.gmra.mrb[56].mxu0 %vm331_vm0, %v322_v60 }
  0x8e   : > { %1740 = vmatprep.mubr.msk.f32.mxu0 %vm331_vm0, %v323_v61 }
  0x91   : > { %1741 = vmatmul.mubr.msk.f32.gmra.mrb[58].mxu0 %vm331_vm0, %v324_v62 }
  0x92   : > { %1743 = vmatprep.mubr.msk.f32.mxu0 %vm331_vm0, %v325_v63 }
  0x95   : > { %1744 = vmatmul.mubr.msk.f32.gmra.mrb[60].mxu0 %vm331_vm0, %v326_v0 }
  0x96   : > { %1746 = vmatprep.mubr.msk.f32.mxu0 %vm331_vm0, %v327_v1 }
  0x99   : > { %1747 = vmatmul.mubr.msk.f32.gmra.mrb[62].mxu0 %vm331_vm0, %v328_v2 }
  0xf0   : > { %v1655_v5 = vpop.f32.mrb[0].mxu0 }
  0xf1   : > { %v917_v6 = vsub.f32 %v1655_v5, %v2216_v4  ;;  %v590_v7 = vpop.f32.mrb[1].mxu0 }
  0xf2   : > { %v916_v8 = vsub.f32 %v590_v7, %v2216_v4 }
  0xf3   : > { %v2220_v9 = vmul.f32 %v917_v6, %v917_v6 }
  0xf4   : > { %v2222_v10 = vmul.f32 %v916_v8, %v916_v8  ;;  %v1658_v11 = vpop.f32.mrb[2].mxu0 }
  0xf5   : > { %v919_v12 = vsub.f32 %v1658_v11, %v2216_v4  ;;  %v600_v13 = vpop.f32.mrb[3].mxu0 }
  0xf6   : > { %v918_v14 = vsub.f32 %v600_v13, %v2216_v4  ;;  %v1755_v15 = vpack.c.bf16 %v2220_v9, %v2222_v10 }
  0xf7   : > { %v2228_v16 = vmul.f32 %v919_v12, %v919_v12 }
  0xf8   : > { %v2230_v17 = vmul.f32 %v918_v14, %v918_v14  ;;  %v1661_v18 = vpop.f32.mrb[4].mxu0 }
  0xf9   : > { %v921_v19 = vsub.f32 %v1661_v18, %v2216_v4  ;;  %v610_v20 = vpop.f32.mrb[5].mxu0  ;;  %v1045_v18 = vld [vmem:[%s2542_s4] sm:$0xff] }
  0xfa   : > { %v1759_v21 = vpack.c.bf16 %v2228_v16, %v2230_v17  ;;  %v920_v22 = vsub.f32 %v610_v20, %v2216_v4 }
  0xfb   : > { %v2236_v23 = vmul.f32 %v921_v19, %v921_v19 }
  0xfc   : > { %v2238_v24 = vmul.f32 %v920_v22, %v920_v22  ;;  %v1664_v25 = vpop.f32.mrb[6].mxu0  ;;  %v1976_v22 = vmov 0  }
  0xfd   : > { %v923_v26 = vsub.f32 %v1664_v25, %v2216_v4  ;;  %v620_v27 = vpop.f32.mrb[7].mxu0  ;;  %1863 = vset.pattern.permute.xlu0 %v1976_v22 }
  0xfe   : > { %v1763_v28 = vpack.c.bf16 %v2236_v23, %v2238_v24  ;;  %v922_v29 = vsub.f32 %v620_v27, %v2216_v4  ;;  %1048 = vperm.xlu0 %1863, %v1045_v18  }
  0xff   : > { %v2244_v30 = vmul.f32 %v923_v26, %v923_v26 }
 0x100   : > { %v2246_v31 = vmul.f32 %v922_v29, %v922_v29  ;;  %v1667_v32 = vpop.f32.mrb[8].mxu0 }
 0x101   : > { %v925_v33 = vsub.f32 %v1667_v32, %v2216_v4  ;;  %v630_v34 = vpop.f32.mrb[9].mxu0 }
 0x102   : > { %v1767_v35 = vpack.c.bf16 %v2244_v30, %v2246_v31  ;;  %v924_v36 = vsub.f32 %v630_v34, %v2216_v4 }
 0x103   : > { %v2252_v37 = vmul.f32 %v925_v33, %v925_v33 }
 0x104   : > { %v2254_v38 = vmul.f32 %v924_v36, %v924_v36  ;;  %v1670_v39 = vpop.f32.mrb[10].mxu0 }
 0x105   : > { %v927_v40 = vsub.f32 %v1670_v39, %v2216_v4  ;;  %v640_v41 = vpop.f32.mrb[11].mxu0 }
 0x106   : > { %v1771_v42 = vpack.c.bf16 %v2252_v37, %v2254_v38  ;;  %v926_v43 = vsub.f32 %v640_v41, %v2216_v4 }
 0x107   : > { %v2260_v44 = vmul.f32 %v927_v40, %v927_v40 }
 0x108   : > { %v2262_v45 = vmul.f32 %v926_v43, %v926_v43  ;;  %v1673_v46 = vpop.f32.mrb[12].mxu0 }
 0x109   : > { %v929_v47 = vsub.f32 %v1673_v46, %v2216_v4  ;;  %v650_v48 = vpop.f32.mrb[13].mxu0 }
 0x10a   : > { %v1775_v49 = vpack.c.bf16 %v2260_v44, %v2262_v45  ;;  %v928_v50 = vsub.f32 %v650_v48, %v2216_v4 }
 0x10b   : > { %v2268_v51 = vmul.f32 %v929_v47, %v929_v47 }
 0x10c   : > { %v2270_v52 = vmul.f32 %v928_v50, %v928_v50  ;;  %v1676_v53 = vpop.f32.mrb[14].mxu0 }
 0x10d   : > { %v931_v54 = vsub.f32 %v1676_v53, %v2216_v4  ;;  %v660_v55 = vpop.f32.mrb[15].mxu0 }
 0x10e   : > { %v1779_v56 = vpack.c.bf16 %v2268_v51, %v2270_v52  ;;  %v930_v57 = vsub.f32 %v660_v55, %v2216_v4 }
 0x10f   : > { %v2276_v58 = vmul.f32 %v931_v54, %v931_v54 }
 0x110   : > { %v2278_v59 = vmul.f32 %v930_v57, %v930_v57  ;;  %v1679_v60 = vpop.f32.mrb[16].mxu0 }
 0x111   : > { %v933_v61 = vsub.f32 %v1679_v60, %v2216_v4  ;;  %v670_v62 = vpop.f32.mrb[17].mxu0 }
 0x112   : > { %v1783_v63 = vpack.c.bf16 %v2276_v58, %v2278_v59  ;;  %v932_v0 = vsub.f32 %v670_v62, %v2216_v4 }
 0x113   : > { %v997_v1 = vmul.f32 %v933_v61, %v933_v61 }
 0x114   : > { %v996_v2 = vmul.f32 %v932_v0, %v932_v0  ;;  %v1682_v5 = vpop.f32.mrb[18].mxu0 }
 0x115   : > { %v935_v6 = vsub.f32 %v1682_v5, %v2216_v4  ;;  %v680_v7 = vpop.f32.mrb[19].mxu0 }
 0x116   : > { %v934_v8 = vsub.f32 %v680_v7, %v2216_v4  ;;  %v1753_v11 = vpack.c.bf16 %v997_v1, %v996_v2 }
 0x117   : > { %v999_v12 = vmul.f32 %v935_v6, %v935_v6 }
 0x118   : > { %v998_v13 = vmul.f32 %v934_v8, %v934_v8  ;;  %v1685_v14 = vpop.f32.mrb[20].mxu0  ;;  %1754 = vmatprep.subr.bf16.mxu1 %v1753_v11 }
 0x119   : > { %v937_v19 = vsub.f32 %v1685_v14, %v2216_v4  ;;  %v690_v20 = vpop.f32.mrb[21].mxu0  ;;  %1756 = vmatpush3.bf16.xpose.msra.mxu1 %v1755_v15 }
 0x11a   : > { %v1757_v25 = vpack.c.bf16 %v999_v12, %v998_v13  ;;  %v936_v26 = vsub.f32 %v690_v20, %v2216_v4 }
 0x11b   : > { %v1001_v27 = vmul.f32 %v937_v19, %v937_v19 }
 0x11c   : > { %v1000_v29 = vmul.f32 %v936_v26, %v936_v26  ;;  %v1688_v32 = vpop.f32.mrb[22].mxu0  ;;  %1758 = vmatprep.subr.bf16.mxu1 %v1757_v25 }
 0x11d   : > { %v939_v33 = vsub.f32 %v1688_v32, %v2216_v4  ;;  %v700_v34 = vpop.f32.mrb[23].mxu0 }
 0x11e   : > { %v1761_v36 = vpack.c.bf16 %v1001_v27, %v1000_v29  ;;  %v938_v39 = vsub.f32 %v700_v34, %v2216_v4 }
 0x11f   : > { %v1003_v40 = vmul.f32 %v939_v33, %v939_v33 }
 0x120   : > { %v1002_v41 = vmul.f32 %v938_v39, %v938_v39  ;;  %v1691_v9 = vpop.f32.mrb[24].mxu0 }
 0x121   : > { %v941_v10 = vsub.f32 %v1691_v9, %v2216_v4  ;;  %v710_v15 = vpop.f32.mrb[25].mxu0  ;;  %1760 = vmatpush3.bf16.xpose.msra.mxu1 %v1759_v21 }
 0x122   : > { %v1765_v43 = vpack.c.bf16 %v1003_v40, %v1002_v41  ;;  %v940_v46 = vsub.f32 %v710_v15, %v2216_v4  ;;  %1762 = vmatprep.subr.bf16.mxu1 %v1761_v36 }
 0x123   : > { %v1005_v47 = vmul.f32 %v941_v10, %v941_v10 }
 0x124   : > { %v1004_v48 = vmul.f32 %v940_v46, %v940_v46  ;;  %v1694_v50 = vpop.f32.mrb[26].mxu0 }
 0x125   : > { %v943_v53 = vsub.f32 %v1694_v50, %v2216_v4  ;;  %v720_v54 = vpop.f32.mrb[27].mxu0 }
 0x126   : > { %v1769_v55 = vpack.c.bf16 %v1005_v47, %v1004_v48  ;;  %v942_v57 = vsub.f32 %v720_v54, %v2216_v4 }
 0x127   : > { %v1007_v60 = vmul.f32 %v943_v53, %v943_v53 }
 0x128   : > { %v1006_v61 = vmul.f32 %v942_v57, %v942_v57  ;;  %v1697_v62 = vpop.f32.mrb[28].mxu0 }
 0x129   : > { %v945_v0 = vsub.f32 %v1697_v62, %v2216_v4  ;;  %v730_v16 = vpop.f32.mrb[29].mxu0  ;;  %1764 = vmatpush3.bf16.xpose.msra.mxu1 %v1763_v28 }
 0x12a   : > { %v1773_v17 = vpack.c.bf16 %v1007_v60, %v1006_v61  ;;  %v944_v21 = vsub.f32 %v730_v16, %v2216_v4  ;;  %1766 = vmatprep.subr.bf16.mxu1 %v1765_v43 }
 0x12b   : > { %v1009_v1 = vmul.f32 %v945_v0, %v945_v0 }
 0x12c   : > { %v1008_v2 = vmul.f32 %v944_v21, %v944_v21  ;;  %v1700_v5 = vpop.f32.mrb[30].mxu0 }
 0x12d   : > { %v947_v6 = vsub.f32 %v1700_v5, %v2216_v4  ;;  %v740_v7 = vpop.f32.mrb[31].mxu0 }
 0x12e   : > { %v1777_v8 = vpack.c.bf16 %v1009_v1, %v1008_v2  ;;  %v946_v11 = vsub.f32 %v740_v7, %v2216_v4 }
 0x12f   : > { %v1011_v12 = vmul.f32 %v947_v6, %v947_v6 }
 0x130   : > { %v1010_v13 = vmul.f32 %v946_v11, %v946_v11  ;;  %v1703_v14 = vpop.f32.mrb[32].mxu0 }
 0x131   : > { %v949_v18 = vsub.f32 %v1703_v14, %v2216_v4  ;;  %v750_v23 = vpop.f32.mrb[33].mxu0  ;;  %1768 = vmatpush3.bf16.xpose.msra.mxu1 %v1767_v35 }
 0x132   : > { %v1781_v24 = vpack.c.bf16 %v1011_v12, %v1010_v13  ;;  %v948_v28 = vsub.f32 %v750_v23, %v2216_v4  ;;  %1770 = vmatprep.subr.bf16.mxu1 %v1769_v55 }
 0x133   : > { %v2315_v19 = vmul.f32 %v949_v18, %v949_v18 }
 0x134   : > { %v2317_v20 = vmul.f32 %v948_v28, %v948_v28  ;;  %v1706_v22 = vpop.f32.mrb[34].mxu0 }
 0x135   : > { %v951_v25 = vsub.f32 %v1706_v22, %v2216_v4  ;;  %v760_v26 = vpop.f32.mrb[35].mxu0 }
 0x136   : > { %v1787_v27 = vpack.c.bf16 %v2315_v19, %v2317_v20  ;;  %v950_v29 = vsub.f32 %v760_v26, %v2216_v4 }
 0x137   : > { %v2323_v32 = vmul.f32 %v951_v25, %v951_v25 }
 0x138   : > { %v2325_v30 = vmul.f32 %v950_v29, %v950_v29  ;;  %v1709_v31 = vpop.f32.mrb[36].mxu0 }
 0x139   : > { %v953_v35 = vsub.f32 %v1709_v31, %v2216_v4  ;;  %v770_v33 = vpop.f32.mrb[37].mxu0  ;;  %1772 = vmatpush3.bf16.xpose.msra.mxu1 %v1771_v42 }
 0x13a   : > { %v1791_v34 = vpack.c.bf16 %v2323_v32, %v2325_v30  ;;  %v952_v36 = vsub.f32 %v770_v33, %v2216_v4  ;;  %1774 = vmatprep.subr.bf16.mxu1 %v1773_v17 }
 0x13b   : > { %v2334_v39 = vmul.f32 %v953_v35, %v953_v35 }
 0x13c   : > { %v2336_v40 = vmul.f32 %v952_v36, %v952_v36  ;;  %v1712_v41 = vpop.f32.mrb[38].mxu0 }
 0x13d   : > { %v955_v9 = vsub.f32 %v1712_v41, %v2216_v4  ;;  %v780_v10 = vpop.f32.mrb[39].mxu0 }
 0x13e   : > { %v1795_v15 = vpack.c.bf16 %v2334_v39, %v2336_v40  ;;  %v954_v37 = vsub.f32 %v780_v10, %v2216_v4 }
 0x13f   : > { %v2342_v38 = vmul.f32 %v955_v9, %v955_v9 }
 0x140   : > { %v2344_v42 = vmul.f32 %v954_v37, %v954_v37  ;;  %v1715_v43 = vpop.f32.mrb[40].mxu0 }
 0x141   : > { %v957_v46 = vsub.f32 %v1715_v43, %v2216_v4  ;;  %v790_v47 = vpop.f32.mrb[41].mxu0  ;;  %1776 = vmatpush3.bf16.xpose.msra.mxu1 %v1775_v49 }
 0x142   : > { %v1799_v48 = vpack.c.bf16 %v2342_v38, %v2344_v42  ;;  %v956_v50 = vsub.f32 %v790_v47, %v2216_v4  ;;  %1778 = vmatprep.subr.bf16.mxu1 %v1777_v8 }
 0x143   : > { %v2353_v53 = vmul.f32 %v957_v46, %v957_v46 }
 0x144   : > { %v2355_v54 = vmul.f32 %v956_v50, %v956_v50  ;;  %v1718_v55 = vpop.f32.mrb[42].mxu0 }
 0x145   : > { %v959_v57 = vsub.f32 %v1718_v55, %v2216_v4  ;;  %v800_v60 = vpop.f32.mrb[43].mxu0 }
 0x146   : > { %v1803_v61 = vpack.c.bf16 %v2353_v53, %v2355_v54  ;;  %v958_v44 = vsub.f32 %v800_v60, %v2216_v4 }
 0x147   : > { %v2361_v45 = vmul.f32 %v959_v57, %v959_v57 }
 0x148   : > { %v2363_v49 = vmul.f32 %v958_v44, %v958_v44  ;;  %v1721_v62 = vpop.f32.mrb[44].mxu0 }
 0x149   : > { %v961_v0 = vsub.f32 %v1721_v62, %v2216_v4  ;;  %v810_v16 = vpop.f32.mrb[45].mxu0  ;;  %1780 = vmatpush3.bf16.xpose.msra.mxu1 %v1779_v56 }
 0x14a   : > { %v1807_v17 = vpack.c.bf16 %v2361_v45, %v2363_v49  ;;  %v960_v21 = vsub.f32 %v810_v16, %v2216_v4  ;;  %1782 = vmatprep.subr.bf16.mxu1 %v1781_v24 }
 0x14b   : > { %v2372_v1 = vmul.f32 %v961_v0, %v961_v0 }
 0x14c   : > { %v2374_v2 = vmul.f32 %v960_v21, %v960_v21  ;;  %v1724_v5 = vpop.f32.mrb[46].mxu0 }
 0x14d   : > { %v963_v6 = vsub.f32 %v1724_v5, %v2216_v4  ;;  %v820_v7 = vpop.f32.mrb[47].mxu0 }
 0x14e   : > { %v1811_v8 = vpack.c.bf16 %v2372_v1, %v2374_v2  ;;  %v962_v51 = vsub.f32 %v820_v7, %v2216_v4 }
 0x14f   : > { %v2380_v52 = vmul.f32 %v963_v6, %v963_v6 }
 0x150   : > { %v2382_v56 = vmul.f32 %v962_v51, %v962_v51  ;;  %v1727_v11 = vpop.f32.mrb[48].mxu0 }
 0x151   : > { %v965_v12 = vsub.f32 %v1727_v11, %v2216_v4  ;;  %v830_v13 = vpop.f32.mrb[49].mxu0  ;;  %1784 = vmatpush3.bf16.xpose.msra.mxu1 %v1783_v63 }
 0x152   : > { %v1815_v14 = vpack.c.bf16 %v2380_v52, %v2382_v56  ;;  %v964_v18 = vsub.f32 %v830_v13, %v2216_v4 }
 0x153   : > { %v1029_v23 = vmul.f32 %v965_v12, %v965_v12 }
 0x154   : > { %v1028_v24 = vmul.f32 %v964_v18, %v964_v18  ;;  %v1730_v28 = vpop.f32.mrb[50].mxu0 }
 0x155   : > { %v967_v22 = vsub.f32 %v1730_v28, %v2216_v4  ;;  %v840_v25 = vpop.f32.mrb[51].mxu0 }
 0x156   : > { %v1785_v26 = vpack.c.bf16 %v1029_v23, %v1028_v24  ;;  %v966_v29 = vsub.f32 %v840_v25, %v2216_v4 }
 0x157   : > { %v1031_v31 = vmul.f32 %v967_v22, %v967_v22 }
 0x158   : > { %v1030_v35 = vmul.f32 %v966_v29, %v966_v29  ;;  %1614 = vmatmul.mubr.f32.vlgmr.msra.gmra.mrb[0].mxu1 %v2210_v3  ;;  %1786 = vmatprep.subr.bf16.mxu1 %v1785_v26  ;;  %v1733_v58 = vpop.f32.mrb[52].mxu0 }
 0x159   : > { %1788 = vmatpush3.bf16.xpose.msra.mxu1 %v1787_v27  ;;  %v969_v59 = vsub.f32 %v1733_v58, %v2216_v4  ;;  %v850_v63 = vpop.f32.mrb[53].mxu0  ;;  %1647 = vmatprep.mubr.f32.mxu1 %v2210_v3 }
 0x15a   : > { %v1789_v33 = vpack.c.bf16 %v1031_v31, %v1030_v35  ;;  %v968_v36 = vsub.f32 %v850_v63, %v2216_v4 }
 0x15b   : > { %v1033_v41 = vmul.f32 %v969_v59, %v969_v59 }
 0x15c   : > { %1790 = vmatprep.subr.bf16.mxu1 %v1789_v33  ;;  %v1032_v9 = vmul.f32 %v968_v36, %v968_v36  ;;  %v1736_v10 = vpop.f32.mrb[54].mxu0 }
 0x15d   : > { %v971_v37 = vsub.f32 %v1736_v10, %v2216_v4  ;;  %v860_v43 = vpop.f32.mrb[55].mxu0 }
 0x15e   : > { %v1793_v46 = vpack.c.bf16 %v1033_v41, %v1032_v9  ;;  %v970_v47 = vsub.f32 %v860_v43, %v2216_v4 }
 0x15f   : > { %v1035_v19 = vmul.f32 %v971_v37, %v971_v37 }
 0x160   : > { %v1034_v20 = vmul.f32 %v970_v47, %v970_v47  ;;  %v1739_v27 = vpop.f32.mrb[56].mxu0 }
 0x161   : > { %1792 = vmatpush3.bf16.xpose.msra.mxu1 %v1791_v34  ;;  %v973_v50 = vsub.f32 %v1739_v27, %v2216_v4  ;;  %v870_v55 = vpop.f32.mrb[57].mxu0 }
 0x162   : > { %1794 = vmatprep.subr.bf16.mxu1 %v1793_v46  ;;  %v1797_v57 = vpack.c.bf16 %v1035_v19, %v1034_v20  ;;  %v972_v60 = vsub.f32 %v870_v55, %v2216_v4 }
 0x163   : > { %v1037_v44 = vmul.f32 %v973_v50, %v973_v50 }
 0x164   : > { %v1036_v62 = vmul.f32 %v972_v60, %v972_v60  ;;  %v1742_v0 = vpop.f32.mrb[58].mxu0 }
 0x165   : > { %v975_v16 = vsub.f32 %v1742_v0, %v2216_v4  ;;  %v880_v21 = vpop.f32.mrb[59].mxu0 }
 0x166   : > { %v1801_v5 = vpack.c.bf16 %v1037_v44, %v1036_v62  ;;  %v974_v6 = vsub.f32 %v880_v21, %v2216_v4 }
 0x167   : > { %v1039_v7 = vmul.f32 %v975_v16, %v975_v16 }
 0x168   : > { %v1038_v51 = vmul.f32 %v974_v6, %v974_v6  ;;  %v1745_v32 = vpop.f32.mrb[60].mxu0 }
 0x169   : > { %1796 = vmatpush3.bf16.xpose.msra.mxu1 %v1795_v15  ;;  %v977_v30 = vsub.f32 %v1745_v32, %v2216_v4  ;;  %v890_v34 = vpop.f32.mrb[61].mxu0 }
 0x16a   : > { %1798 = vmatprep.subr.bf16.mxu1 %v1797_v57  ;;  %v1805_v11 = vpack.c.bf16 %v1039_v7, %v1038_v51  ;;  %v976_v12 = vsub.f32 %v890_v34, %v2216_v4 }
 0x16b   : > { %v1041_v13 = vmul.f32 %v977_v30, %v977_v30 }
 0x16c   : > { %v1040_v18 = vmul.f32 %v976_v12, %v976_v12  ;;  %v1748_v23 = vpop.f32.mrb[62].mxu0 }
 0x16d   : > { %v979_v24 = vsub.f32 %v1748_v23, %v2216_v4  ;;  %v900_v28 = vpop.f32.mrb[63].mxu0 }
 0x16e   : > { %v1809_v22 = vpack.c.bf16 %v1041_v13, %v1040_v18  ;;  %v978_v25 = vsub.f32 %v900_v28, %v2216_v4 }
 0x16f   : > { %v1043_v26 = vmul.f32 %v979_v24, %v979_v24 }
 0x170   : > { %v1042_v29 = vmul.f32 %v978_v25, %v978_v25 }
 0x171   : > { %1800 = vmatpush3.bf16.xpose.msra.mxu1 %v1799_v48 }
 0x172   : > { %1802 = vmatprep.subr.bf16.mxu1 %v1801_v5  ;;  %v1813_v39 = vpack.c.bf16 %v1043_v26, %v1042_v29 }
 0x179   : > { %1804 = vmatpush3.bf16.xpose.msra.mxu1 %v1803_v61 }
 0x17a   : > { %1806 = vmatprep.subr.bf16.mxu1 %v1805_v11 }
 0x17d   : > { %v1049_v4 = vpop.permute.xlu0 %1048 }
 0x181   : > { %1808 = vmatpush3.bf16.xpose.msra.mxu1 %v1807_v17 }
 0x182   : > { %1810 = vmatprep.subr.bf16.mxu1 %v1809_v22 }
 0x189   : > { %1812 = vmatpush3.bf16.xpose.msra.mxu1 %v1811_v8 }
 0x18a   : > { %1814 = vmatprep.subr.bf16.mxu1 %v1813_v39 }
 0x191   : > { %1816 = vmatpush3.bf16.xpose.msra.mxu1 %v1815_v14 }
 0x198   : > { %1648 = vmatmul.mubr.f32.vlgmr.msra.gmra.mrb[2].mxu1 %v2210_v3 }
 0x22b   : > { %v1117_v40 = vpop.f32.mrb[0].mxu1 }
 0x22c   : > { %v1118_v15 = vadd.f32 %v1117_v40, %v1049_v4  ;;  %v1119_v38 = vpop.f32.mrb[1].mxu1 }
 0x22d   : > { %v1120_v42 = vadd.f32 %v1119_v38, %v1049_v4 }
 0x22e   : > { %v1193_v48 = vrot.slane %v1118_v15, 4 }
 0x22f   : > { %v1199_v53 = vrot.slane %v1120_v42, 4 }
 0x230   : > { %v1194_v54 = vmax.f32 %v1118_v15, %v1193_v48 }
 0x231   : > { %v1200_v61 = vmax.f32 %v1120_v42, %v1199_v53 }
 0x232   : > { %v1195_v45 = vrot.slane %v1194_v54, 2 }
 0x233   : > { %v1201_v49 = vrot.slane %v1200_v61, 2 }
 0x234   : > { %v1196_v17 = vmax.f32 %v1194_v54, %v1195_v45 }
 0x235   : > { %v1202_v1 = vmax.f32 %v1200_v61, %v1201_v49 }
 0x236   : > { %v1197_v2 = vrot.slane %v1196_v17, 1 }
 0x237   : > { %v1203_v8 = vrot.slane %v1202_v1, 1 }
 0x238   : > { %v1198_v31 = vmax.f32 %v1196_v17, %v1197_v2 }
 0x239   : > { %v1204_v52 = vmax.f32 %v1202_v1, %v1203_v8  ;;  %v1977_v8 = vmov 1966171168  }
 0x23a   : > { %v1217_v56 = vsub.f32 %v1118_v15, %v1198_v31 }
 0x23b   : > { %v1218_v14 = vsub.f32 %v1120_v42, %v1204_v52 }
 0x23c   : > { %v1221_v3 = vmul.f32 1.442695, %v1217_v56 }
 0x23d   : > { %v1223_v35 = vmul.f32 1.442695, %v1218_v14 }
 0x23e   : > { %1864 = vpow2.f32 %v1221_v3 }
 0x23f   : > { %1866 = vpow2.f32 %v1223_v35 }
 0x248   : > { %v1865_v58 = vpop.eup %1864 }
 0x249   : > { %v1867_v59 = vpop.eup %1866  ;;  %v1229_v63 = vrot.slane %v1865_v58, 4 }
 0x24a   : > { %v1235_v33 = vrot.slane %v1867_v59, 4 }
 0x24b   : > { %v1230_v36 = vadd.f32 %v1865_v58, %v1229_v63 }
 0x24c   : > { %v1236_v41 = vadd.f32 %v1867_v59, %v1235_v33 }
 0x24d   : > { %v1231_v9 = vrot.slane %v1230_v36, 2 }
 0x24e   : > { %v1237_v10 = vrot.slane %v1236_v41, 2 }
 0x24f   : > { %v1232_v37 = vadd.f32 %v1231_v9, %v1230_v36 }
 0x250   : > { %v1238_v43 = vadd.f32 %v1237_v10, %v1236_v41 }
 0x251   : > { %v1233_v46 = vrot.slane %v1232_v37, 1 }
 0x252   : > { %v1239_v47 = vrot.slane %v1238_v43, 1 }
 0x253   : > { %v1234_v19 = vadd.f32 %v1233_v46, %v1232_v37 }
 0x254   : > { %v1240_v20 = vadd.f32 %v1239_v47, %v1238_v43 }
 0x255   : > { %1868 = vlog2.f32 %v1234_v19 }
 0x256   : > { %1870 = vlog2.f32 %v1240_v20 }
 0x25f   : > { %v1869_v27 = vpop.eup %1868 }
 0x260   : > { %v1871_v50 = vpop.eup %1870  ;;  %v1254_v55 = vmul.f32 0.6931472, %v1869_v27 }
 0x261   : > { %v1256_v57 = vmul.f32 0.6931472, %v1871_v50 }
 0x262   : > { %v2436_v60 = vadd.f32 %v1254_v55, %v1198_v31  ;;  %v1280_v31 = vunpack.c.l.s4 %v1977_v8 }
 0x263   : > { %v2438_v44 = vadd.f32 %v1256_v57, %v1204_v52  ;;  %v1282_v52 = vlaneseq }
 0x264   : > { %v1265_v62 = vsub.f32 %v1118_v15, %v2436_v60  ;;  %v1281_v14 = vunpack.c.0.s8 %v1280_v31 }
 0x265   : > { %v1266_v0 = vsub.f32 %v1120_v42, %v2438_v44  ;;  %v1277_v16 = vcombine.low %v2436_v60, %v2438_v44  ;;  %v1283_v3 = vshrl.u32 %v1282_v52, 7 }
 0x266   : > { %1269 = vst [vmem:[%s2444_s12] sm:$0xff] %v1265_v62 }
 0x267   : > { %1270 = vst [vmem:[%s2444_s12 + $0x8] sm:$0xff] %v1266_v0  ;;  %v1284_v36 = vsub.s32 %v1281_v14, %v1283_v3 }
 0x269   : > { %v1285_v37 = vrot.slane %v1277_v16, %v1284_v36 }
 0x26b   : > { %v1188_v21 = vpop.f32.mrb[2].mxu1 }
 0x26c   : > { %v1189_v5 = vadd.f32 %v1188_v21, %v1049_v4  ;;  %v1190_v6 = vpop.f32.mrb[3].mxu1 }
 0x26d   : > { %v1191_v7 = vadd.f32 %v1190_v6, %v1049_v4 }
 0x26e   : > { %v1205_v51 = vrot.slane %v1189_v5, 4 }
 0x26f   : > { %v1211_v32 = vrot.slane %v1191_v7, 4 }
 0x270   : > { %v1206_v30 = vmax.f32 %v1189_v5, %v1205_v51 }
 0x271   : > { %v1212_v34 = vmax.f32 %v1191_v7, %v1211_v32 }
 0x272   : > { %v1207_v11 = vrot.slane %v1206_v30, 2 }
 0x273   : > { %v1213_v12 = vrot.slane %v1212_v34, 2 }
 0x274   : > { %v1208_v13 = vmax.f32 %v1206_v30, %v1207_v11 }
 0x275   : > { %v1214_v18 = vmax.f32 %v1212_v34, %v1213_v12 }
 0x276   : > { %v1209_v23 = vrot.slane %v1208_v13, 1 }
 0x277   : > { %v1215_v24 = vrot.slane %v1214_v18, 1 }
 0x278   : > { %v1210_v28 = vmax.f32 %v1208_v13, %v1209_v23 }
 0x279   : > { %v1216_v22 = vmax.f32 %v1214_v18, %v1215_v24 }
 0x27a   : > { %v1219_v25 = vsub.f32 %v1189_v5, %v1210_v28 }
 0x27b   : > { %v1220_v26 = vsub.f32 %v1191_v7, %v1216_v22 }
 0x27c   : > { %v1225_v29 = vmul.f32 1.442695, %v1219_v25 }
 0x27d   : > { %v1227_v39 = vmul.f32 1.442695, %v1220_v26 }
 0x27e   : > { %1872 = vpow2.f32 %v1225_v29 }
 0x27f   : > { %1874 = vpow2.f32 %v1227_v39 }
 0x288   : > { %v1873_v40 = vpop.eup %1872 }
 0x289   : > { %v1875_v4 = vpop.eup %1874  ;;  %v1241_v15 = vrot.slane %v1873_v40, 4 }
 0x28a   : > { %v1247_v38 = vrot.slane %v1875_v4, 4 }
 0x28b   : > { %v1242_v42 = vadd.f32 %v1873_v40, %v1241_v15 }
 0x28c   : > { %v1248_v48 = vadd.f32 %v1875_v4, %v1247_v38 }
 0x28d   : > { %v1243_v53 = vrot.slane %v1242_v42, 2 }
 0x28e   : > { %v1249_v54 = vrot.slane %v1248_v48, 2 }
 0x28f   : > { %v1244_v61 = vadd.f32 %v1243_v53, %v1242_v42 }
 0x290   : > { %v1250_v45 = vadd.f32 %v1249_v54, %v1248_v48 }
 0x291   : > { %v1245_v49 = vrot.slane %v1244_v61, 1 }
 0x292   : > { %v1251_v17 = vrot.slane %v1250_v45, 1 }
 0x293   : > { %v1246_v1 = vadd.f32 %v1245_v49, %v1244_v61 }
 0x294   : > { %v1252_v2 = vadd.f32 %v1251_v17, %v1250_v45 }
 0x295   : > { %1876 = vlog2.f32 %v1246_v1 }
 0x296   : > { %1878 = vlog2.f32 %v1252_v2 }
 0x29f   : > { %v1877_v56 = vpop.eup %1876 }
 0x2a0   : > { %v1879_v35 = vpop.eup %1878  ;;  %v1258_v58 = vmul.f32 0.6931472, %v1877_v56 }
 0x2a1   : > { %v1260_v59 = vmul.f32 0.6931472, %v1879_v35 }
 0x2a2   : > { %v1263_v63 = vadd.f32 %v1258_v58, %v1210_v28 }
 0x2a3   : > { %v1264_v33 = vadd.f32 %v1260_v59, %v1216_v22 }
 0x2a4   : > { %v1267_v41 = vsub.f32 %v1189_v5, %v1263_v63 }
 0x2a5   : > { %v1268_v9 = vsub.f32 %v1191_v7, %v1264_v33  ;;  %v1278_v10 = vcombine.low %v1263_v63, %v1264_v33 }
 0x2a6   : > { %1271 = vst [vmem:[%s2444_s12 + $0x10] sm:$0xff] %v1267_v41 }
 0x2a7   : > { %1272 = vst [vmem:[%s2444_s12 + $0x18] sm:$0xff] %v1268_v9  ;;  %v1292_v43 = vrot.slane %v1278_v10, %v1284_v36 }
 0x2a8   : > { %1893 = shalt.err (!%p1890_p3)
}
 0x2a9   : > { %s1894_s12 = scalar_lea.hbm %s2454_s19, 512  ;;  %s1898_s17 = scalar_lea.hbm %s2543_s5, 4096 }
 0x2aa   : > { %p1895_p4 = scmp.ne.s32.totalorder %s2454_s19, %s1894_s12  ;;  %p1899_p9 = scmp.lt.u32.totalorder %s2454_s19, %s2543_s5 }
 0x2ab   : > { %p1900_p10 = scmp.lt.u32.totalorder %s1898_s17, %s1894_s12  ;;  %p1902_p12 = scmp.lt.u32.totalorder %s1894_s12, %s2454_s19 }
 0x2ac   : > { %p1896_p7 = pnand %p1895_p4, %p2053_p5 }
 0x2ad   : > { %p1901_p11 = por %p1900_p10, %p1899_p9 }
 0x2ae   : > { %p1897_p8 = pneg %p1896_p7 }
 0x2af   : > { %p1903_p13 = por %p1902_p12, %p1901_p11 }
 0x2b1   : > { %p1904_p0 = pnand %p1903_p13, %p1897_p8 }
 0x2b3   : > { %1907 = shalt.err (!%p1904_p0)
}
 0x2b4   : > { %1817 = dma.vmem_to_hbm [thread:$0]  (%p2053_p5), %s2456_s16, 512, %s2454_s19, %s1308_s26   ;;  %v1293_v46 = vcombine.low %v1285_v37, %v1292_v43  ;;  %vm1304_vm1 = vcmp.lt.s32.totalorder %v1282_v52, 512 }
 0x2b5   : > { %s2492_s11 = scalar_lea.hbm %s2544_s6, %s2070_s13  ;;  %s1313_s12 = scalar_lea.sflag [#allocation5], %s2433_s10 }
 0x2b6   : > { %v1300_v47 = vrot.slane %v1293_v46, %v1284_v36  ;;  %s1908_s14 = scalar_lea.vmem %s2496_s20, 64  ;;  %s1979_s16 = smov [#allocation4]  }
 0x2b7   : > { %p1909_p1 = scmp.ne.s32.totalorder %s2496_s20, %s1908_s14  ;;  %s1912_s19 = sshll.u32 %s1979_s16, 4  ;;  %s1913_s19 = int_to_ptr.vmem [resolvable:$false] %s1912_s19 }
 0x2b8   : > { %1306 = vst.msk [vmem:[%s2463_s25] sm:$0xf] %vm1304_vm1, %v1300_v47  ;;  %s1914_s26 = scalar_lea.vmem %s1913_s19, 128  ;;  %p1915_p4 = scmp.lt.s32.totalorder %s2496_s20, %s1913_s19 }
 0x2b9   : > { %p1910_p2 = pnand %p1909_p1, %p2053_p5  ;;  %p1916_p7 = scmp.lt.s32.totalorder %s1914_s26, %s1908_s14 }
 0x2bb   : > { %p1911_p3 = pneg %p1910_p2  ;;  %p1917_p8 = por %p1916_p7, %p1915_p4 }
 0x2bd   : > { %p1918_p9 = pnand %p1917_p8, %p1911_p3 }
 0x2bf   : > { %1921 = shalt.err (!%p1918_p9)
}
 0x2c0   : > { %s1922_s13 = scalar_lea.hbm %s2492_s11, 64  ;;  %s1926_s15 = scalar_lea.hbm %s2544_s6, 512 }
 0x2c1   : > { %p1923_p10 = scmp.ne.s32.totalorder %s2492_s11, %s1922_s13  ;;  %p1927_p13 = scmp.lt.u32.totalorder %s2492_s11, %s2544_s6 }
 0x2c2   : > { %p1928_p0 = scmp.lt.u32.totalorder %s1926_s15, %s1922_s13  ;;  %p1930_p2 = scmp.lt.u32.totalorder %s1922_s13, %s2492_s11 }
 0x2c3   : > { %p1924_p11 = pnand %p1923_p10, %p2053_p5 }
 0x2c4   : > { %p1929_p1 = por %p1928_p0, %p1927_p13 }
 0x2c5   : > { %p1925_p12 = pneg %p1924_p11 }
 0x2c6   : > { %p1931_p3 = por %p1930_p2, %p1929_p1 }
 0x2c8   : > { %p1932_p4 = pnand %p1931_p3, %p1925_p12 }
 0x2ca   : > { %1935 = shalt.err (!%p1932_p4)
}
 0x2cb   : > { %1818 = dma.vmem_to_hbm [thread:$0]  (%p2053_p5), %s2496_s20, 64, %s2492_s11, %s1313_s12  }
 0x2cc PF: > { %p1828_p7 = scmp.ge.s32.totalorder %s1974_s24, 2  ;;  %s1353_s29 = sand.u32 1, %s1962_s21  }
 0x2cd   : > { %s1354_s28 = scalar_lea.sflag [#allocation3], %s1353_s29 }
 0x2ce   : > { %p1822_p8 = pnand %p1828_p7, %p2057_p6 }
 0x2d0   : > { %1953 = dma.done.wait (!%p1822_p8), %s1354_s28, 512  }
 0x2d1   : > { %1955 = vsyncadd (!%p1822_p8), %s1354_s28, 4294966784  ;;  %s1363_s9 = scalar_lea.sflag [#allocation5], %s1353_s29 }
 0x2d2   : > { %1957 = dma.done.wait (!%p1822_p8), %s1363_s9, 64  }
 0x2d3   : > { %1959 = vsyncadd (!%p1822_p8), %s1363_s9, 4294967232  ;;  %p20_p5 = scmp.ge.s32.totalorder %s2040_s27, 10   ;;  %s2547_s21 = smov %s1966_s22 }
 0x2d4   : > { %s2548_s22 = smov %s1970_s23  ;;  %s2549_s23 = smov %s2051_s30 }
 0x2d5   : > { %s2550_s24 = smov %s2040_s27  ;;  %22 = sbr.rel (!%p20_p5) target bundleno = 5 (0x5), region = 92 }
 0x2dc   :  { %1368 = vsyncpa [#allocation3], 1 }
 0x2dd   :  { %1370 = vsyncpa [#allocation3 + $0x1], 1 }
 0x2de   :  { %1371 = vsyncpa [#allocation5], 1 }
 0x2df   :  { %1373 = vsyncpa [#allocation5 + $0x1], 1 }

</bundles_post_ra>
